<compile_context>
chip_gen: v7x
topology: tpu7x:2x2x1
jax: 0.10.0
libtpu: 0.0.40
codegen_flags: <defaults>
</compile_context>

<pallas_src>
import math

import jax
import jax.numpy as jnp
from jax.experimental import pallas as pl
from jax.experimental.pallas import tpu as pltpu


def _round_up(x: int, m: int) -> int:
    return ((x + m - 1) // m) * m


# ----------------------------- Pallas kernel --------------------------------
def prune_grow_fwd_kernel(x_ref, w1_ref, b1_ref, w2_ref, b2_ref, o_ref):
    # Cast the x tile to bf16 in VMEM (VPU work hidden under the DMA shadow).
    x = x_ref[...].astype(jnp.bfloat16)

    # Layer 1: bf16 x bf16 MXU matmul, f32 accumulate, f32 bias + ReLU.
    h = jnp.dot(x, w1_ref[...], preferred_element_type=jnp.float32)
    h = jnp.maximum(h + b1_ref[...], 0.0)

    # Layer 2 (prediction head, padded to 128 output lanes): bf16 matmul,
    # f32 accumulate, f32 bias, lane-dense store.
    out = jnp.dot(h.astype(jnp.bfloat16), w2_ref[...],
                  preferred_element_type=jnp.float32)
    o_ref[...] = (out + b2_ref[...]).astype(o_ref.dtype)


# ------------------------------- wrapper -------------------------------------
def prune_grow_forward(x_nchw, params, *, tile_b=2048,
                       compute_dtype=jnp.bfloat16, out_dtype=jnp.float32):
    """x_nchw: (B, 1, 28, 28) float32. Returns (B, 10) `out_dtype` logits."""
    w1, a1, b1, w2, a2, b2 = params

    B = x_nchw.shape[0]
    x_flat = x_nchw.reshape(B, -1)                            # nn.Flatten (view)
    K = x_flat.shape[1]                                       # 784
    H = w1.shape[1]                                           # 16
    NC = w2.shape[1]                                          # 10
    NC_PAD = 128                                              # lane-dense output

    # Batch tiling: force a multiple of 8 sublanes; guarantee >= 2 grid steps
    # whenever the batch allows (both v7x TensorCores get work, pipelining is
    # real); never exceed the (rounded-up) batch.
    tile_b = max(8, (int(tile_b) // 8) * 8)
    if B >= 16:
        tile_b = min(tile_b, _round_up(-(-B // 2), 8))        # grid >= 2
    tile_b = min(tile_b, _round_up(B, 8))
    grid = (pl.cdiv(B, tile_b),)                              # ragged last block OK

    # Hoist the prune/grow mask multiply out of the hot path (the mask only
    # changes at host-side prune/grow events).
    w_isize = jnp.dtype(compute_dtype).itemsize
    out_isize = jnp.dtype(out_dtype).itemsize
    w1m = (w1 * a1).astype(compute_dtype)                     # (784, 16)
    w2m = (w2 * a2).astype(compute_dtype)                     # (16, 10)
    w2m_pad = jnp.pad(w2m, ((0, 0), (0, NC_PAD - NC)))        # (16, 128)
    b1_2d = b1.reshape(1, H).astype(jnp.float32)              # (1, 16)
    b2_pad = jnp.pad(b2.reshape(1, NC).astype(jnp.float32),
                     ((0, 0), (0, NC_PAD - NC)))              # (1, 128)

    # VMEM budget: double-buffered x/out blocks, resident weights/biases, plus
    # in-kernel intermediates (bf16 x copy, h, f32 out).  Cap at 56 MiB so
    # Mosaic keeps scratch headroom on v7x's 64 MiB VMEM.
    vmem_bytes = (2 * tile_b * K * 4                          # x blocks (f32)
                  + 2 * tile_b * NC_PAD * out_isize           # out blocks
                  + 2 * (K * H * w_isize + H * NC_PAD * w_isize
                         + H * 4 + NC_PAD * 4)                # weights/biases
                  + tile_b * K * w_isize                      # bf16 x copy
                  + tile_b * H * 4 + tile_b * NC_PAD * 4)     # h, f32 out
    vmem_limit = min(max(int(vmem_bytes * 1.5) + (2 << 20), 32 * 1024 * 1024),
                     56 * 1024 * 1024)

    cost = pl.CostEstimate(
        flops=2 * B * K * H + 2 * B * H * NC_PAD,
        transcendentals=0,
        bytes_accessed=(B * K * 4                             # x read (f32)
                        + K * H * w_isize + H * NC_PAD * w_isize
                        + H * 4 + NC_PAD * 4                  # weights/biases
                        + B * NC_PAD * out_isize),            # out write
    )

    fwd = pl.pallas_call(
        prune_grow_fwd_kernel,
        out_shape=jax.ShapeDtypeStruct((B, NC_PAD), out_dtype),
        grid=grid,
        in_specs=[
            pl.BlockSpec((tile_b, K), lambda i: (i, 0)),      # x: batch-tiled
            pl.BlockSpec((K, H), lambda i: (0, 0)),           # W1*A1: resident
            pl.BlockSpec((1, H), lambda i: (0, 0)),           # b1
            pl.BlockSpec((H, NC_PAD), lambda i: (0, 0)),      # W2*A2 (padded)
            pl.BlockSpec((1, NC_PAD), lambda i: (0, 0)),      # b2 (padded)
        ],
        out_specs=pl.BlockSpec((tile_b, NC_PAD), lambda i: (i, 0)),
        compiler_params=pltpu.CompilerParams(
            dimension_semantics=("parallel",),                # v7x: 2 TCs
            vmem_limit_bytes=vmem_limit,
        ),
        cost_estimate=cost,
    )
    out_pad = fwd(x_flat, w1m, b1_2d, w2m_pad, b2_pad)
    # Callers that can consume the padded (B, 128) slab should skip this slice.
    return out_pad[:, :NC]


# --------------------------- parameter construction --------------------------
def _make_layer_params(key, input_dim, output_dim, init_density):
    """Mimics BaseDenseLayer / PredictionHead __init__ deterministically."""
    k_idx, k_w = jax.random.split(key)

    num_init = int(init_density * input_dim * output_dim)
    # np.random.choice with replacement -> randint with replacement
    flat_idx = jax.random.randint(k_idx, (num_init,), 0, input_dim * output_dim)
    A = jnp.zeros((input_dim * output_dim,), jnp.float32).at[flat_idx].set(1.0)
    A = A.reshape(input_dim, output_dim)

    # kaiming_uniform_ on (input_dim, output_dim): fan_in = dim 1
    bound = math.sqrt(6.0 / output_dim)
    W = jax.random.uniform(k_w, (input_dim, output_dim), jnp.float32,
                           minval=-bound, maxval=bound)
    W = W * A                                                 # zero dead weights
    b = jnp.zeros((output_dim,), jnp.float32)
    return W, A, b


def make_params(key, init_density=0.5):
    k1, k2 = jax.random.split(key)
    w1, a1, b1 = _make_layer_params(k1, 28 * 28, 16, init_density)  # BaseDenseLayer
    w2, a2, b2 = _make_layer_params(k2, 16, 10, init_density)       # PredictionHead
    return (w1, a1, b1, w2, a2, b2)


# TODO(synk): update_params / rand_grow / activity_prune are stochastic
# host-side training-loop mutations of A/W (not part of forward); not kernelized.


def _reference(x_nchw, params):
    """Plain-JAX reference using the same bf16-operand / f32-accumulate recipe."""
    w1, a1, b1, w2, a2, b2 = params
    xf = x_nchw.reshape(x_nchw.shape[0], -1).astype(jnp.bfloat16)
    w1m = (w1 * a1).astype(jnp.bfloat16)
    h = jnp.dot(xf, w1m, preferred_element_type=jnp.float32) + b1
    h = jnp.maximum(h, 0.0)
    w2m = (w2 * a2).astype(jnp.bfloat16)
    return jnp.dot(h.astype(jnp.bfloat16), w2m,
                   preferred_element_type=jnp.float32) + b2


# ------------------------------------ main -----------------------------------
if __name__ == "__main__":
    key = jax.random.PRNGKey(0)
    k_params, k_x1, k_x2 = jax.random.split(key, 3)

    params = make_params(k_params, init_density=0.5)

    # Small MNIST-like NCHW input: batch=8, channels=1, 28x28.
    x = jax.random.normal(k_x1, (8, 1, 28, 28), jnp.float32)
    logits = prune_grow_forward(x, params)
    jax.block_until_ready(logits)
    assert logits.shape == (8, 10)
    ref = _reference(x, params)
    assert jnp.allclose(logits, ref, atol=2e-2, rtol=2e-2)

    # Exercise the multi-block + ragged-last-block path (B not a tile multiple).
    x2 = jax.random.normal(k_x2, (50, 1, 28, 28), jnp.float32)
    logits2 = prune_grow_forward(x2, params, tile_b=16)
    jax.block_until_ready(logits2)
    assert logits2.shape == (50, 10)
    ref2 = _reference(x2, params)
    assert jnp.allclose(logits2, ref2, atol=2e-2, rtol=2e-2)

    print("KERNEL_OK")
</pallas_src>

<mosaic_0001>
module attributes {stable_mosaic.version = 11 : i64} {
  func.func @prune_grow_fwd_kernel(%arg0: i32, %arg1: memref<8x784xf32, #tpu.memory_space<vmem>>, %arg2: memref<784x16xbf16, #tpu.memory_space<vmem>>, %arg3: memref<1x16xf32, #tpu.memory_space<vmem>>, %arg4: memref<16x128xbf16, #tpu.memory_space<vmem>>, %arg5: memref<1x128xf32, #tpu.memory_space<vmem>>, %arg6: memref<8x128xf32, #tpu.memory_space<vmem>>) attributes {dimension_semantics = [#tpu.dimension_semantics<parallel>], iteration_bounds = array<i64: 1>, scalar_prefetch = 0 : i64, scratch_operands = 0 : i64, tpu.core_type = #tpu.core_type<tc>, window_params = [{transform_indices = @transform_0, window_bounds = array<i64: 8, 784>}, {pipeline_mode = #tpu.pipeline_mode<synchronous>, transform_indices = @transform_1, window_bounds = array<i64: 784, 16>}, {pipeline_mode = #tpu.pipeline_mode<synchronous>, transform_indices = @transform_2, window_bounds = array<i64: 1, 16>}, {pipeline_mode = #tpu.pipeline_mode<synchronous>, transform_indices = @transform_3, window_bounds = array<i64: 16, 128>}, {pipeline_mode = #tpu.pipeline_mode<synchronous>, transform_indices = @transform_4, window_bounds = array<i64: 1, 128>}, {transform_indices = @transform_5, window_bounds = array<i64: 8, 128>}]} {
    %c0 = arith.constant 0 : index
    %c0_0 = arith.constant 0 : index
    %0 = vector.load %arg1[%c0, %c0_0] : memref<8x784xf32, #tpu.memory_space<vmem>>, vector<8x784xf32>
    %1 = arith.truncf %0 : vector<8x784xf32> to vector<8x784xbf16>
    %c0_1 = arith.constant 0 : index
    %c0_2 = arith.constant 0 : index
    %2 = vector.load %arg2[%c0_1, %c0_2] : memref<784x16xbf16, #tpu.memory_space<vmem>>, vector<784x16xbf16>
    %cst = arith.constant dense<0.000000e+00> : vector<8x16xf32>
    %3 = tpu.matmul %1, %2, %cst {dimension_numbers = #tpu.dot_dimension_numbers<[1], [0], [0], [1], [0, 0, 1, 1], [], []>} : vector<8x784xbf16>, vector<784x16xbf16>, vector<8x16xf32> -> vector<8x16xf32>
    %c0_3 = arith.constant 0 : index
    %c0_4 = arith.constant 0 : index
    %4 = vector.load %arg3[%c0_3, %c0_4] : memref<1x16xf32, #tpu.memory_space<vmem>>, vector<1x16xf32>
    %5 = vector.broadcast %4 : vector<1x16xf32> to vector<8x16xf32>
    %6 = arith.addf %3, %5 : vector<8x16xf32>
    %cst_5 = arith.constant 0.000000e+00 : f32
    %7 = vector.broadcast %cst_5 : f32 to vector<8x16xf32>
    %8 = arith.maximumf %6, %7 : vector<8x16xf32>
    %9 = arith.truncf %8 : vector<8x16xf32> to vector<8x16xbf16>
    %c0_6 = arith.constant 0 : index
    %c0_7 = arith.constant 0 : index
    %10 = vector.load %arg4[%c0_6, %c0_7] : memref<16x128xbf16, #tpu.memory_space<vmem>>, vector<16x128xbf16>
    %cst_8 = arith.constant dense<0.000000e+00> : vector<8x128xf32>
    %11 = tpu.matmul %9, %10, %cst_8 {dimension_numbers = #tpu.dot_dimension_numbers<[1], [0], [0], [1], [0, 0, 1, 1], [], []>} : vector<8x16xbf16>, vector<16x128xbf16>, vector<8x128xf32> -> vector<8x128xf32>
    %c0_9 = arith.constant 0 : index
    %c0_10 = arith.constant 0 : index
    %12 = vector.load %arg5[%c0_9, %c0_10] : memref<1x128xf32, #tpu.memory_space<vmem>>, vector<1x128xf32>
    %13 = vector.broadcast %12 : vector<1x128xf32> to vector<8x128xf32>
    %14 = arith.addf %11, %13 : vector<8x128xf32>
    %c0_11 = arith.constant 0 : index
    %c0_12 = arith.constant 0 : index
    %15 = vector.load %arg6[%c0_11, %c0_12] : memref<8x128xf32, #tpu.memory_space<vmem>>, vector<8x128xf32>
    tpu.vector_store %arg6[%c0_11, %c0_12], %14 {strides = array<i32>} : memref<8x128xf32, #tpu.memory_space<vmem>>, vector<8x128xf32>,
    return
  }
  func.func @transform_0(%arg0: i32) -> (i32, i32) {
    %c0_i32 = arith.constant 0 : i32
    %c0_i32_0 = arith.constant 0 : i32
    return %arg0, %c0_i32 : i32, i32
  }
  func.func @transform_1(%arg0: i32) -> (i32, i32) {
    %c0_i32 = arith.constant 0 : i32
    %c0_i32_0 = arith.constant 0 : i32
    %c0_i32_1 = arith.constant 0 : i32
    return %c0_i32, %c0_i32_0 : i32, i32
  }
  func.func @transform_2(%arg0: i32) -> (i32, i32) {
    %c0_i32 = arith.constant 0 : i32
    %c0_i32_0 = arith.constant 0 : i32
    %c0_i32_1 = arith.constant 0 : i32
    return %c0_i32, %c0_i32_0 : i32, i32
  }
  func.func @transform_3(%arg0: i32) -> (i32, i32) {
    %c0_i32 = arith.constant 0 : i32
    %c0_i32_0 = arith.constant 0 : i32
    %c0_i32_1 = arith.constant 0 : i32
    return %c0_i32, %c0_i32_0 : i32, i32
  }
  func.func @transform_4(%arg0: i32) -> (i32, i32) {
    %c0_i32 = arith.constant 0 : i32
    %c0_i32_0 = arith.constant 0 : i32
    %c0_i32_1 = arith.constant 0 : i32
    return %c0_i32, %c0_i32_0 : i32, i32
  }
  func.func @transform_5(%arg0: i32) -> (i32, i32) {
    %c0_i32 = arith.constant 0 : i32
    %c0_i32_0 = arith.constant 0 : i32
    return %arg0, %c0_i32 : i32, i32
  }
}

</mosaic_0001>

<bundles_post_ra>
// kernel: tpu_custom_call.1
= control target key start
LH: loop header
LB: loop body
LE: loop exit
PB: predicated region body
PF: predicated region fallthrough
CT: control target
= control target key end

     0   :  { %v887_v44 = vmov 0.0   ;;  %vm888_vm0 = vmmov 0   ;;  %vm435_vm1 = vcmask 130048   ;;  %s1113_s0 = inlined_call_operand.vmem [shape: f32[8,784], index: 0, kind: input, shape index: {}]   ;;  %s1114_s1 = inlined_call_operand.vmem [shape: bf16[784,16], index: 1, kind: input, shape index: {}]   ;;  %s1115_s2 = inlined_call_operand.vmem [shape: f32[1,16], index: 2, kind: input, shape index: {}]   ;;  %s1116_s3 = inlined_call_operand.vmem [shape: bf16[16,128], index: 3, kind: input, shape index: {}]   ;;  %s1117_s4 = inlined_call_operand.vmem [shape: f32[1,128], index: 4, kind: input, shape index: {}]   ;;  %s1118_s5 = inlined_call_operand.hbm [shape: f32[8,128], index: 5, kind: output, shape index: {}]  }
   0x1   :  { %v813_v0 = vld [vmem:[%s1114_s1 + $0x40] sm:$0xff]   ;;  %v817_v4 = vld [vmem:[%s1114_s1 + $0x48] sm:$0xff]   ;;  %v821_v8 = vld [vmem:[%s1114_s1 + $0x50] sm:$0xff]  }
   0x2   :  { %v814_v1 = vld [vmem:[%s1114_s1] sm:$0xff]   ;;  %728 = vmatprep.subr.bf16.mxu0 %v813_v0  ;;  %v818_v5 = vld [vmem:[%s1114_s1 + $0x8] sm:$0xff]   ;;  %v822_v9 = vld [vmem:[%s1114_s1 + $0x10] sm:$0xff]  }
   0x3   :  { %v815_v2 = vld [vmem:[%s1114_s1 + $0xc0] sm:$0xff]   ;;  %729 = vmatpush3.bf16.msra.mxu0 %v814_v1  ;;  %v819_v6 = vld [vmem:[%s1114_s1 + $0xc8] sm:$0xff]   ;;  %v823_v10 = vld [vmem:[%s1114_s1 + $0xd0] sm:$0xff]  }
   0x4   :  { %v816_v3 = vld [vmem:[%s1114_s1 + $0x80] sm:$0xff]   ;;  %750 = vmatprep.subr.bf16.mxu1 %v815_v2  ;;  %730 = vmatprep.subr.bf16.mxu0 %v817_v4  ;;  %v820_v7 = vld [vmem:[%s1114_s1 + $0x88] sm:$0xff]   ;;  %v824_v11 = vld [vmem:[%s1114_s1 + $0x90] sm:$0xff]  }
   0x5   :  { %751 = vmatpush3.bf16.msra.mxu1 %v816_v3  ;;  %v825_v12 = vld [vmem:[%s1114_s1 + $0x58] sm:$0xff]   ;;  %v829_v16 = vld [vmem:[%s1114_s1 + $0x60] sm:$0xff]   ;;  %v833_v20 = vld [vmem:[%s1114_s1 + $0x68] sm:$0xff]  }
   0x6   :  { %752 = vmatprep.subr.bf16.mxu1 %v819_v6  ;;  %v826_v13 = vld [vmem:[%s1114_s1 + $0x18] sm:$0xff]   ;;  %v830_v17 = vld [vmem:[%s1114_s1 + $0x20] sm:$0xff]   ;;  %v834_v21 = vld [vmem:[%s1114_s1 + $0x28] sm:$0xff]  }
   0x7   :  { %731 = vmatpush3.bf16.msra.mxu0 %v818_v5  ;;  %v827_v14 = vld [vmem:[%s1114_s1 + $0xd8] sm:$0xff]   ;;  %v831_v18 = vld [vmem:[%s1114_s1 + $0xe0] sm:$0xff]   ;;  %v835_v22 = vld [vmem:[%s1114_s1 + $0xe8] sm:$0xff]  }
   0x8   :  { %732 = vmatprep.subr.bf16.mxu0 %v821_v8  ;;  %v828_v15 = vld [vmem:[%s1114_s1 + $0x98] sm:$0xff]   ;;  %v832_v19 = vld [vmem:[%s1114_s1 + $0xa0] sm:$0xff]   ;;  %v836_v23 = vld [vmem:[%s1114_s1 + $0xa8] sm:$0xff]  }
   0x9   :  { %753 = vmatpush3.bf16.msra.mxu1 %v820_v7  ;;  %v837_v24 = vld [vmem:[%s1114_s1 + $0x70] sm:$0xff]   ;;  %v841_v28 = vld [vmem:[%s1114_s1 + $0x78] sm:$0xff]   ;;  %v23_v31 = vld [vmem:[%s1113_s0 + $0x8] sm:$0xff] }
   0xa   :  { %754 = vmatprep.subr.bf16.mxu1 %v823_v10  ;;  %v838_v25 = vld [vmem:[%s1114_s1 + $0x30] sm:$0xff]   ;;  %v842_v29 = vld [vmem:[%s1114_s1 + $0x38] sm:$0xff]   ;;  %v30_v32 = vpack.c.bf16 %v23_v31, %v23_v31  ;;  %v22_v34 = vld [vmem:[%s1113_s0] sm:$0xff] }
   0xb   :  { %733 = vmatpush3.bf16.msra.mxu0 %v822_v9  ;;  %v839_v26 = vld [vmem:[%s1114_s1 + $0xf0] sm:$0xff]   ;;  %v843_v30 = vld [vmem:[%s1114_s1 + $0xf8] sm:$0xff]   ;;  %v29_v35 = vpack.c.bf16 %v22_v34, %v22_v34  ;;  %v845_v36 = vld [vmem:[%s1114_s1 + $0x140] sm:$0xff]  }
   0xc   :  { %734 = vmatprep.subr.bf16.mxu0 %v825_v12  ;;  %v840_v27 = vld [vmem:[%s1114_s1 + $0xb0] sm:$0xff]   ;;  %v844_v33 = vld [vmem:[%s1114_s1 + $0xb8] sm:$0xff]   ;;  %471 = vmatprep.mubr.bf16.mxu0 %v30_v32  ;;  %v846_v39 = vld [vmem:[%s1114_s1 + $0x100] sm:$0xff]  }
   0xd   :  { %755 = vmatpush3.bf16.msra.mxu1 %v824_v11  ;;  %v25_v37 = vld [vmem:[%s1113_s0 + $0x18] sm:$0xff]  ;;  %v24_v40 = vld [vmem:[%s1113_s0 + $0x10] sm:$0xff]  ;;  %v847_v42 = vld [vmem:[%s1114_s1 + $0x148] sm:$0xff]  }
   0xe   :  { %756 = vmatprep.subr.bf16.mxu1 %v827_v14  ;;  %v32_v38 = vpack.c.bf16 %v25_v37, %v25_v37  ;;  %v31_v41 = vpack.c.bf16 %v24_v40, %v24_v40  ;;  %v848_v43 = vld [vmem:[%s1114_s1 + $0x108] sm:$0xff]   ;;  %v849_v45 = vld [vmem:[%s1114_s1 + $0x150] sm:$0xff]   ;;  %v851_v47 = vld [vmem:[%s1114_s1 + $0x158] sm:$0xff]  }
   0xf   :  { %735 = vmatpush3.bf16.msra.mxu0 %v826_v13  ;;  %v850_v46 = vld [vmem:[%s1114_s1 + $0x110] sm:$0xff]   ;;  %v852_v48 = vld [vmem:[%s1114_s1 + $0x118] sm:$0xff]   ;;  %v853_v49 = vld [vmem:[%s1114_s1 + $0x160] sm:$0xff]  }
  0x10   :  { %736 = vmatprep.subr.bf16.mxu0 %v829_v16  ;;  %511 = vmatprep.mubr.bf16.mxu1 %v32_v38  ;;  %v854_v50 = vld [vmem:[%s1114_s1 + $0x120] sm:$0xff]   ;;  %v855_v51 = vld [vmem:[%s1114_s1 + $0x168] sm:$0xff]   ;;  %v28_v55 = vld [vmem:[%s1113_s0 + $0x30] sm:$0xff] }
  0x11   :  { %757 = vmatpush3.bf16.msra.mxu1 %v828_v15  ;;  %v861_v52 = vld [vmem:[%s1114_s1 + $0x180] sm:$0xff]   ;;  %v27_v53 = vld [vmem:[%s1113_s0 + $0x28] sm:$0xff]  ;;  %v35_v57 = vpack.c.bf16 %v28_v55, %v28_v55 }
  0x12   :  { %758 = vmatprep.subr.bf16.mxu1 %v831_v18  ;;  %v34_v54 = vpack.c.bf16 %v27_v53, %v27_v53  ;;  %v856_v56 = vld [vmem:[%s1114_s1 + $0x128] sm:$0xff]  }
  0x13   :  { %737 = vmatpush3.bf16.msra.mxu0 %v830_v17 }
  0x14   :  { %738 = vmatprep.subr.bf16.mxu0 %v833_v20 }
  0x15   :  { %759 = vmatpush3.bf16.msra.mxu1 %v832_v19 }
  0x16   :  { %760 = vmatprep.subr.bf16.mxu1 %v835_v22 }
  0x17   :  { %739 = vmatpush3.bf16.msra.mxu0 %v834_v21 }
  0x18   :  { %740 = vmatprep.subr.bf16.mxu0 %v837_v24 }
  0x19   :  { %761 = vmatpush3.bf16.msra.mxu1 %v836_v23 }
  0x1a   :  { %762 = vmatprep.subr.bf16.mxu1 %v839_v26 }
  0x1b   :  { %741 = vmatpush3.bf16.msra.mxu0 %v838_v25 }
  0x1c   :  { %742 = vmatprep.subr.bf16.mxu0 %v841_v28 }
  0x1d   :  { %763 = vmatpush3.bf16.msra.mxu1 %v840_v27 }
  0x1e   :  { %764 = vmatprep.subr.bf16.mxu1 %v843_v30 }
  0x1f   :  { %743 = vmatpush3.bf16.msra.mxu0 %v842_v29 }
  0x20   :  { %772 = vmatprep.subr.bf16.mxu0 %v845_v36 }
  0x21   :  { %765 = vmatpush3.bf16.msra.mxu1 %v844_v33 }
  0x22   :  { %472 = vmatmul.mubr.bf16.vlgmr.msra.gmra.mrb[0].mxu0 %v29_v35  ;;  %798 = vmatprep.subr.bf16.mxu1 %v887_v44 }
  0x23   :  { %773 = vmatpush3.bf16.msra.mxu0 %v846_v39 }
  0x24   :  { %512 = vmatmul.mubr.bf16.vlgmr.msra.gmra.mrb[0].mxu1 %v31_v41  ;;  %774 = vmatprep.subr.bf16.mxu0 %v847_v42 }
  0x25   :  { %800 = vmatprep.mubr.msk.bf16.mxu1 %vm888_vm0, %v887_v44  ;;  %799 = vmatpush3.bf16.msra.mxu1 %v861_v52 }
  0x27   :  { %775 = vmatpush3.bf16.msra.mxu0 %v848_v43 }
  0x28   :  { %776 = vmatprep.subr.bf16.mxu0 %v849_v45 }
  0x2b   :  { %777 = vmatpush3.bf16.msra.mxu0 %v850_v46 }
  0x2c   :  { %778 = vmatprep.subr.bf16.mxu0 %v851_v47 }
  0x2f   :  { %779 = vmatpush3.bf16.msra.mxu0 %v852_v48 }
  0x30   :  { %780 = vmatprep.subr.bf16.mxu0 %v853_v49 }
  0x33   :  { %781 = vmatpush3.bf16.msra.mxu0 %v854_v50 }
  0x34   :  { %10 = vsyncpa [#allocation3], 0  ;;  %782 = vmatprep.subr.bf16.mxu0 %v855_v51  ;;  %v857_v58 = vld [vmem:[%s1114_s1 + $0x170] sm:$0xff]   ;;  %551 = vmatprep.mubr.bf16.mxu0 %v34_v54  ;;  %v859_v60 = vld [vmem:[%s1114_s1 + $0x178] sm:$0xff]  }
  0x35   :  { %804 = vmatprep.subr.bf16.mxu1 %v887_v44  ;;  %801 = vmatmul.mubr.msk.bf16.vlgmr.msra.gmra.mrb[4].mxu1 %vm435_vm1, %v35_v57  ;;  %v858_v59 = vld [vmem:[%s1114_s1 + $0x130] sm:$0xff]   ;;  %v860_v61 = vld [vmem:[%s1114_s1 + $0x138] sm:$0xff]   ;;  %v26_v62 = vld [vmem:[%s1113_s0 + $0x20] sm:$0xff] }
  0x36   :  { %806 = vmatprep.mubr.msk.bf16.mxu1 %vm888_vm0, %v887_v44  ;;  %v33_v63 = vpack.c.bf16 %v26_v62, %v26_v62  ;;  %v862_v0 = vld [vmem:[%s1116_s3] sm:$0xff]  }
  0x37   :  { %783 = vmatpush3.bf16.msra.mxu0 %v856_v56  ;;  %805 = vmatpush3.bf16.msra.mxu1 %v862_v0  ;;  %v674_v2 = vld [vmem:[%s1115_s2] ss:$0 sm:$0xff]  ;;  %s889_s2 = smov [#allocation2]  }
  0x38   :  { %784 = vmatprep.subr.bf16.mxu0 %v857_v58  ;;  %v725_v27 = vld [vmem:[%s1117_s4] ss:$0 sm:$0xff]  ;;  %s666_s3 = sshll.u32 %s889_s2, 4  ;;  %s667_s3 = int_to_ptr.vmem [resolvable:$true] %s666_s3 }
  0x39   :  { %s863_s9 = scalar_lea.vmem %s667_s3, 128  ;;  %p868_p1 = scmp.lt.s32.totalorder %s667_s3, %s667_s3 }
  0x3a   :  { %p864_p0 = scmp.ne.s32.totalorder %s667_s3, %s863_s9  ;;  %p869_p2 = scmp.lt.s32.totalorder %s863_s9, %s863_s9 }
  0x3b   :  { %785 = vmatpush3.bf16.msra.mxu0 %v858_v59 }
  0x3c   :  { %786 = vmatprep.subr.bf16.mxu0 %v859_v60  ;;  %p870_p3 = por %p869_p2, %p868_p1 }
  0x3e   :  { %p871_p4 = pnand %p870_p3, %p864_p0 }
  0x3f   :  { %787 = vmatpush3.bf16.msra.mxu0 %v860_v61 }
  0x42   :  { %552 = vmatmul.mubr.bf16.vlgmr.msra.gmra.mrb[4].mxu0 %v33_v63 }
  0xf5   :  { %v744_v1 = vpop.f32.mrb[0].mxu0 }
  0xf6   :  { %v745_v3 = vpop.f32.mrb[1].mxu0 }
  0xf7   :  { %v746_v4 = vadd.f32 %v745_v3, %v744_v1  ;;  %v747_v5 = vpop.f32.mrb[2].mxu0  ;;  %v766_v6 = vpop.f32.mrb[0].mxu1 }
  0xf8   :  { %v748_v7 = vpop.f32.mrb[3].mxu0  ;;  %v767_v9 = vpop.f32.mrb[1].mxu1 }
  0xf9   :  { %v474_v8 = vadd.f32 %v746_v4, %v674_v2  ;;  %v768_v10 = vadd.f32 %v767_v9, %v766_v6  ;;  %v769_v11 = vpop.f32.mrb[2].mxu1 }
  0xfa   :  { %v770_v12 = vpop.f32.mrb[3].mxu1 }
  0xfb   :  { %v514_v13 = vadd.f32 %v768_v10, %v474_v8 }
 0x108   :  { %v593_v14 = vpop.f32.mrb[4].mxu1 }
 0x109   :  { %v802_v15 = vpop.f32.mrb[5].mxu1 }
 0x10a   :  { %v596_v16 = vpop.f32.mrb[6].mxu1 }
 0x10b   :  { %v803_v17 = vpop.f32.mrb[7].mxu1 }
 0x115   :  { %v788_v18 = vpop.f32.mrb[4].mxu0 }
 0x116   :  { %v789_v19 = vpop.f32.mrb[5].mxu0 }
 0x117   :  { %v790_v20 = vadd.f32 %v789_v19, %v788_v18  ;;  %v791_v21 = vpop.f32.mrb[6].mxu0 }
 0x118   :  { %v792_v22 = vpop.f32.mrb[7].mxu0 }
 0x119   :  { %v554_v23 = vadd.f32 %v790_v20, %v514_v13 }
 0x11b   :  { %v594_v24 = vadd.f32 %v593_v14, %v554_v23 }
 0x11d   :  { %v599_v25 = vmax.f32 %v594_v24, 0.0 }
 0x11f   :  { %v600_v26 = vpack.c.bf16 %v599_v25, %v599_v25 }
 0x121   :  { %807 = vmatmul.mubr.msk.bf16.vlgmr.msra.gmra.mrb[8].mxu1 %vm435_vm1, %v600_v26 }
 0x1f4   :  { %v653_v28 = vpop.f32.mrb[8].mxu1 }
 0x1f5   :  { %v654_v29 = vadd.f32 %v725_v27, %v653_v28  ;;  %v808_v30 = vpop.f32.mrb[9].mxu1 }
 0x1f6   :  { %v656_v31 = vpop.f32.mrb[10].mxu1 }
 0x1f7   :  { %659 = vst [vmem:[#allocation2] sm:$0xff] %v654_v29  ;;  %v809_v32 = vpop.f32.mrb[11].mxu1 }
 0x1f8   :  { %874 = shalt.err (!%p871_p4)
}
 0x1f9   :  { %s875_s4 = scalar_lea.hbm %s1118_s5, 128 }
 0x1fa   :  { %p876_p5 = scmp.ne.s32.totalorder %s1118_s5, %s875_s4  ;;  %p879_p6 = scmp.lt.u32.totalorder %s875_s4, %s1118_s5 }
 0x1fc   :  { %p881_p7 = pnand %p879_p6, %p876_p5 }
 0x1fe   :  { %884 = shalt.err (!%p881_p7)
}
 0x1ff   :  { %669 = dma.vmem_to_hbm [thread:$0]  %s667_s3, 128, %s1118_s5, [#allocation3]  }
 0x200   :  { %885 = dma.done.wait [#allocation3], 128  }
 0x201   :  { %886 = vsyncadd [#allocation3], 4294967168 }
 0x202   :  { %673 = vsyncpa [#allocation3], 1 }

</bundles_post_ra>
